<compile_context>
chip_gen: v7x
topology: tpu7x:2x2x1
jax: 0.10.0
libtpu: 0.0.40
codegen_flags: <defaults>
</compile_context>

<pallas_src>
import functools

import jax
import jax.numpy as jnp
import numpy as np
from jax.experimental import pallas as pl
from jax.experimental.pallas import tpu as pltpu

CONV_PAD = 1   # Conv2d padding
POOL_K = 3     # AvgPool2d kernel
POOL_PAD = 11  # AvgPool2d padding


def _fused_kernel(x_ref, wbd_ref, bias_ref, o_ref, *, cout, ho, wo):
    # x_ref   : (1, Hs, W*Cin)   one image, NHWC rows pre-padded to slab height
    # wbd_ref : (W*Cin, Ws*Cout) block-diag 1x1-conv weights, already placed at
    #                            the pool-padded output lane offsets
    # bias_ref: (Hs, Ws*Cout)    bias over the conv-output region, 0 elsewhere
    # o_ref   : (1, Ho, Wo*Cout) pooled output, NHWC-packed (lane-dense)
    lanes_valid = wo * cout

    # ---- 1x1 conv for all channels/positions in ONE MXU push ----------------
    # The block-diagonal weights scatter the interior directly into the
    # pool-padded slab; padding stays exactly zero because act(0) == 0.
    v1 = jnp.dot(x_ref[0], wbd_ref[...],
                 preferred_element_type=jnp.float32,
                 precision=jax.lax.Precision.HIGHEST) + bias_ref[...]

    # ---- fused activation (single pass, SSA value, no scratch) --------------
    # v6 = v1 * clamp(v1 + 16, 0, 32) / 32
    v6 = v1 * jnp.clip(v1 + 16.0, 0.0, 32.0) * (1.0 / 32.0)      # (Hs, Ws*Cout)

    # ---- separable 3x3 average pool (count_include_pad -> /9) ---------------
    # W-direction tap = shift by Cout lanes (channels innermost in the lanes).
    wsum = (v6[:, 0:lanes_valid]
            + v6[:, cout:lanes_valid + cout]
            + v6[:, 2 * cout:lanes_valid + 2 * cout])             # (Hs, Wo*Cout)
    hsum = wsum[0:ho] + wsum[1:ho + 1] + wsum[2:ho + 2]           # (Ho, Wo*Cout)

    # ---- single dense store of the whole output block ------------------------
    o_ref[0] = hsum * (1.0 / (POOL_K * POOL_K))


def model_forward(x, w, b):
    # x: (N, Cin, H, W) f32 NCHW;  w: (Cout, Cin, 1, 1);  b: (Cout,)
    n, cin, h, wdt = x.shape
    cout = w.shape[0]
    hp, wp = h + 2 * CONV_PAD, wdt + 2 * CONV_PAD       # conv output spatial
    hs_rows = hp + 2 * POOL_PAD                         # pool-padded slab rows
    ws_cols = wp + 2 * POOL_PAD                         # pool-padded slab w-positions
    ho = hs_rows - POOL_K + 1                           # stride 1 -> ceil == floor
    wo = ws_cols - POOL_K + 1
    lanes = ws_cols * cout
    off = POOL_PAD + CONV_PAD                           # where x interior lands in slab

    # ---- wrapper-side layout plumbing (tiny XLA ops, traced once) -----------
    # NHWC, W*Cin flattened into lanes, rows zero-padded to the slab height.
    x_rows = jnp.transpose(x, (0, 2, 3, 1)).reshape(n, h, wdt * cin)
    x_slab = jnp.pad(x_rows, ((0, 0), (off, hs_rows - off - h), (0, 0)))

    # Block-diagonal 1x1-conv weights: input w-position i -> slab w-position off+i.
    w2 = w.reshape(cout, cin).T.astype(jnp.float32)                       # (Cin, Cout)
    sel = (jnp.arange(ws_cols)[None, :]
           == (jnp.arange(wdt) + off)[:, None]).astype(jnp.float32)      # (W, Ws)
    wbd = jnp.kron(sel, w2)                                               # (W*Cin, Ws*Cout)

    # Bias over the conv-output region (rows/cols POOL_PAD..POOL_PAD+hp-1), 0 outside.
    row_in = ((jnp.arange(hs_rows) >= POOL_PAD)
              & (jnp.arange(hs_rows) < POOL_PAD + hp)).astype(jnp.float32)
    col_in = ((jnp.arange(ws_cols) >= POOL_PAD)
              & (jnp.arange(ws_cols) < POOL_PAD + wp)).astype(jnp.float32)
    bias_slab = row_in[:, None] * (jnp.repeat(col_in, cout)
                                   * jnp.tile(b, ws_cols))[None, :]       # (Hs, Ws*Cout)

    kernel = functools.partial(_fused_kernel, cout=cout, ho=ho, wo=wo)
    out = pl.pallas_call(
        kernel,
        grid=(n,),
        in_specs=[
            pl.BlockSpec((1, hs_rows, wdt * cin), lambda i: (i, 0, 0)),
            pl.BlockSpec((wdt * cin, lanes), lambda i: (0, 0)),   # resident (same block)
            pl.BlockSpec((hs_rows, lanes), lambda i: (0, 0)),     # resident (same block)
        ],
        out_specs=pl.BlockSpec((1, ho, wo * cout), lambda i: (i, 0, 0)),
        out_shape=jax.ShapeDtypeStruct((n, ho, wo * cout), jnp.float32),
        compiler_params=pltpu.CompilerParams(
            dimension_semantics=("parallel",)),       # 2 grid steps -> both v7x TCs
    )(x_slab, wbd, bias_slab)

    # (N, Ho, Wo*Cout) -> (N, Cout, Ho, Wo)   (pure layout plumbing in the wrapper)
    return out.reshape(n, ho, wo, cout).transpose(0, 3, 1, 2)


def ref_forward(x, w, b):
    # Independent pure-JAX reference for verification.
    v1 = jax.lax.conv_general_dilated(
        x, w, window_strides=(1, 1), padding=((1, 1), (1, 1)),
        dimension_numbers=("NCHW", "OIHW", "NCHW"),
        precision=jax.lax.Precision.HIGHEST) + b.reshape(1, -1, 1, 1)
    v4 = jnp.clip(v1 + 16.0, 0.0, 32.0)
    v6 = v1 * v4 / 32.0
    s = jax.lax.reduce_window(
        v6, 0.0, jax.lax.add, (1, 1, POOL_K, POOL_K), (1, 1, 1, 1),
        padding=((0, 0), (0, 0), (POOL_PAD, POOL_PAD), (POOL_PAD, POOL_PAD)))
    return s / float(POOL_K * POOL_K)


if __name__ == "__main__":
    key = jax.random.PRNGKey(0)
    kx, kw, kb = jax.random.split(key, 3)

    # Small shapes consistent with the module: batch=2, Cin=3 -> Cout=12, 16x16 spatial.
    N, CIN, H, W, COUT = 2, 3, 16, 16, 12
    x = jax.random.normal(kx, (N, CIN, H, W), jnp.float32)
    w = jax.random.normal(kw, (COUT, CIN, 1, 1), jnp.float32) * 0.5
    b = jax.random.normal(kb, (COUT,), jnp.float32) * 0.1

    out = jax.jit(model_forward)(x, w, b)
    out = jax.block_until_ready(out)

    ref = ref_forward(x, w, b)
    assert out.shape == ref.shape, (out.shape, ref.shape)
    np.testing.assert_allclose(np.asarray(out), np.asarray(ref), rtol=1e-4, atol=1e-4)
    print("KERNEL_OK")
</pallas_src>

<mosaic_0001>
module attributes {stable_mosaic.version = 11 : i64} {
  func.func @_fused_kernel(%arg0: i32, %arg1: memref<1x40x48xf32, #tpu.memory_space<vmem>>, %arg2: memref<48x480xf32, #tpu.memory_space<vmem>>, %arg3: memref<40x480xf32, #tpu.memory_space<vmem>>, %arg4: memref<1x38x456xf32, #tpu.memory_space<vmem>>) attributes {dimension_semantics = [#tpu.dimension_semantics<parallel>], iteration_bounds = array<i64: 2>, scalar_prefetch = 0 : i64, scratch_operands = 0 : i64, tpu.core_type = #tpu.core_type<tc>, window_params = [{transform_indices = @transform_0, window_bounds = array<i64: 1, 40, 48>}, {pipeline_mode = #tpu.pipeline_mode<synchronous>, transform_indices = @transform_1, window_bounds = array<i64: 48, 480>}, {pipeline_mode = #tpu.pipeline_mode<synchronous>, transform_indices = @transform_2, window_bounds = array<i64: 40, 480>}, {transform_indices = @transform_3, window_bounds = array<i64: 1, 38, 456>}]} {
    %c0 = arith.constant 0 : index
    %c0_0 = arith.constant 0 : index
    %c0_1 = arith.constant 0 : index
    %0 = vector.load %arg1[%c0, %c0_0, %c0_1] : memref<1x40x48xf32, #tpu.memory_space<vmem>>, vector<1x40x48xf32>
    %1 = vector.shape_cast %0 : vector<1x40x48xf32> to vector<40x48xf32>
    %c0_2 = arith.constant 0 : index
    %c0_3 = arith.constant 0 : index
    %2 = vector.load %arg2[%c0_2, %c0_3] : memref<48x480xf32, #tpu.memory_space<vmem>>, vector<48x480xf32>
    %cst = arith.constant dense<0.000000e+00> : vector<40x480xf32>
    %3 = tpu.matmul %1, %2, %cst {dimension_numbers = #tpu.dot_dimension_numbers<[1], [0], [0], [1], [0, 0, 1, 1], [], []>, precision = #tpu.contract_precision<fp32>} : vector<40x48xf32>, vector<48x480xf32>, vector<40x480xf32> -> vector<40x480xf32>
    %c0_4 = arith.constant 0 : index
    %c0_5 = arith.constant 0 : index
    %4 = vector.load %arg3[%c0_4, %c0_5] : memref<40x480xf32, #tpu.memory_space<vmem>>, vector<40x480xf32>
    %5 = arith.addf %3, %4 : vector<40x480xf32>
    %cst_6 = arith.constant 1.600000e+01 : f32
    %6 = vector.broadcast %cst_6 : f32 to vector<40x480xf32>
    %7 = arith.addf %5, %6 : vector<40x480xf32>
    %cst_7 = arith.constant 0.000000e+00 : f32
    %cst_8 = arith.constant 3.200000e+01 : f32
    %8 = vector.broadcast %cst_7 : f32 to vector<40x480xf32>
    %9 = arith.maximumf %8, %7 : vector<40x480xf32>
    %10 = vector.broadcast %cst_8 : f32 to vector<40x480xf32>
    %11 = arith.minimumf %10, %9 : vector<40x480xf32>
    %12 = arith.mulf %5, %11 : vector<40x480xf32>
    %cst_9 = arith.constant 3.125000e-02 : f32
    %13 = vector.broadcast %cst_9 : f32 to vector<40x480xf32>
    %14 = arith.mulf %12, %13 : vector<40x480xf32>
    %15 = vector.extract_strided_slice %14 {offsets = [0, 0], sizes = [40, 456], strides = [1, 1]} : vector<40x480xf32> to vector<40x456xf32>
    %16 = vector.extract_strided_slice %14 {offsets = [0, 12], sizes = [40, 456], strides = [1, 1]} : vector<40x480xf32> to vector<40x456xf32>
    %17 = arith.addf %15, %16 : vector<40x456xf32>
    %18 = vector.extract_strided_slice %14 {offsets = [0, 24], sizes = [40, 456], strides = [1, 1]} : vector<40x480xf32> to vector<40x456xf32>
    %19 = arith.addf %17, %18 : vector<40x456xf32>
    %20 = vector.extract_strided_slice %19 {offsets = [0, 0], sizes = [38, 456], strides = [1, 1]} : vector<40x456xf32> to vector<38x456xf32>
    %21 = vector.extract_strided_slice %19 {offsets = [1, 0], sizes = [38, 456], strides = [1, 1]} : vector<40x456xf32> to vector<38x456xf32>
    %22 = arith.addf %20, %21 : vector<38x456xf32>
    %23 = vector.extract_strided_slice %19 {offsets = [2, 0], sizes = [38, 456], strides = [1, 1]} : vector<40x456xf32> to vector<38x456xf32>
    %24 = arith.addf %22, %23 : vector<38x456xf32>
    %cst_10 = arith.constant 0.111111112 : f32
    %25 = vector.broadcast %cst_10 : f32 to vector<38x456xf32>
    %26 = arith.mulf %24, %25 : vector<38x456xf32>
    %c0_11 = arith.constant 0 : index
    %c0_12 = arith.constant 0 : index
    %c0_13 = arith.constant 0 : index
    %27 = vector.load %arg4[%c0_11, %c0_12, %c0_13] : memref<1x38x456xf32, #tpu.memory_space<vmem>>, vector<1x38x456xf32>
    %28 = vector.shape_cast %27 : vector<1x38x456xf32> to vector<38x456xf32>
    %29 = vector.shape_cast %26 : vector<38x456xf32> to vector<1x38x456xf32>
    tpu.vector_store %arg4[%c0_11, %c0_12, %c0_13], %29 {strides = array<i32>} : memref<1x38x456xf32, #tpu.memory_space<vmem>>, vector<1x38x456xf32>,
    return
  }
  func.func @transform_0(%arg0: i32) -> (i32, i32, i32) {
    %c0_i32 = arith.constant 0 : i32
    %c0_i32_0 = arith.constant 0 : i32
    %c0_i32_1 = arith.constant 0 : i32
    return %arg0, %c0_i32, %c0_i32_0 : i32, i32, i32
  }
  func.func @transform_1(%arg0: i32) -> (i32, i32) {
    %c0_i32 = arith.constant 0 : i32
    %c0_i32_0 = arith.constant 0 : i32
    %c0_i32_1 = arith.constant 0 : i32
    return %c0_i32, %c0_i32_0 : i32, i32
  }
  func.func @transform_2(%arg0: i32) -> (i32, i32) {
    %c0_i32 = arith.constant 0 : i32
    %c0_i32_0 = arith.constant 0 : i32
    %c0_i32_1 = arith.constant 0 : i32
    return %c0_i32, %c0_i32_0 : i32, i32
  }
  func.func @transform_3(%arg0: i32) -> (i32, i32, i32) {
    %c0_i32 = arith.constant 0 : i32
    %c0_i32_0 = arith.constant 0 : i32
    %c0_i32_1 = arith.constant 0 : i32
    return %arg0, %c0_i32, %c0_i32_0 : i32, i32, i32
  }
}

</mosaic_0001>

<bundles_post_ra>
// kernel: model_forward.1
= control target key start
LH: loop header
LB: loop body
LE: loop exit
PB: predicated region body
PF: predicated region fallthrough
CT: control target
= control target key end

     0   :  { %s2718_s12 = smov 0   ;;  %s3743_s0 = inlined_call_operand.vmem [shape: f32[2,40,48], index: 0, kind: input, shape index: {}]   ;;  %s3744_s1 = inlined_call_operand.vmem [shape: f32[48,480], index: 1, kind: input, shape index: {}]   ;;  %s3745_s2 = inlined_call_operand.vmem [shape: f32[40,480], index: 2, kind: input, shape index: {}]   ;;  %s3746_s3 = inlined_call_operand.vmem [shape: f32[2,38,456], index: 3, kind: output, shape index: {}]  }
   0x1 LB: > { %s2401_s13 = sadd.s32 4294967295, %s2693_s12   ;;  %p2405_p0 = scmp.ge.s32.totalorder %s2693_s12, 1  ;;  %s2693_s12 = sphi %s2718_s12, %s13_s12  }
   0x2   : > { %p137_p1 = scmp.lt.s32.totalorder %s2693_s12, 3 }
   0x4   : > { %p138_p2 = pnand %p2405_p0, %p137_p1 }
   0x6   : > { %141 = sbr.rel (%p138_p2) target bundleno = 582 (0x246), region = 32 }
   0xd   : > { %v177_v0 = vld [vmem:[%s3744_s1 + $0x8] sm:$0xff]  ;;  %v179_v2 = vld [vmem:[%s3744_s1 + $0x18] sm:$0xff]  ;;  %p2737_p3 = scmp.lt.s32.totalorder %s2401_s13, 1  ;;  %v176_v7 = vld [vmem:[%s3744_s1] sm:$0xff]  ;;  %v3766_v9 = vmov 0.0   ;;  %vm220_vm0 = vcmask 392192  }
   0xe   : > { %v181_v1 = vld [vmem:[%s3744_s1 + $0x28] sm:$0xff]  ;;  %v236_v3 = vand.u32 4294901760, %v177_v0  ;;  %v183_v5 = vld [vmem:[%s3744_s1 + $0x38] sm:$0xff]  ;;  %v1027_v6 = vand.u32 4294901760, %v179_v2  ;;  %v180_v8 = vld [vmem:[%s3744_s1 + $0x20] sm:$0xff]  ;;  %312 = vmatprep.mubr.f32.mxu0 %v3766_v9  ;;  %1103 = vmatprep.mubr.f32.mxu1 %v3766_v9  ;;  %v238_v11 = vand.u32 4294901760, %v176_v7 }
   0xf   : > { %v240_v4 = vand.u32 4294901760, %v181_v1  ;;  %v1031_v10 = vand.u32 4294901760, %v183_v5  ;;  %v242_v12 = vand.u32 4294901760, %v180_v8  ;;  %v178_v13 = vld [vmem:[%s3744_s1 + $0x10] sm:$0xff]  ;;  %v185_v15 = vld [vmem:[%s3744_s1 + $0x48] sm:$0xff]  ;;  %v187_v21 = vld [vmem:[%s3744_s1 + $0x58] sm:$0xff] }
  0x10   : > { %v182_v14 = vld [vmem:[%s3744_s1 + $0x30] sm:$0xff]  ;;  %v2763_v17 = vsub.f32 %v177_v0, %v236_v3  ;;  %v2767_v19 = vsub.f32 %v179_v2, %v1027_v6  ;;  %v189_v20 = vld [vmem:[%s3744_s1 + $0x68] sm:$0xff]  ;;  %v191_v22 = vld [vmem:[%s3744_s1 + $0x78] sm:$0xff]  ;;  %v2784_v26 = vsub.f32 %v176_v7, %v238_v11  ;;  %s3824_s13 = smov (!%p2737_p3, %s2401_s13), 1  ;;  %v1029_v29 = vand.u32 4294901760, %v178_v13  ;;  %s2696_s6 = smov 116  }
  0x11   : > { %v2761_v16 = vpack.c.bf16 %v240_v4, %v236_v3  ;;  %v2765_v18 = vsub.f32 %v181_v1, %v240_v4  ;;  %v2778_v23 = vpack.c.bf16 %v1031_v10, %v1027_v6  ;;  %v2780_v24 = vsub.f32 %v183_v5, %v1031_v10  ;;  %v184_v27 = vld [vmem:[%s3744_s1 + $0x40] sm:$0xff]  ;;  %v186_v37 = vld [vmem:[%s3744_s1 + $0x50] sm:$0xff]  ;;  %v193_v43 = vld [vmem:[%s3744_s1 + $0x88] sm:$0xff]  ;;  %s2674_s30 = smul.u32 40, %s3824_s13  ;;  %s2697_s7 = smov 104  }
  0x12   : > { %v2782_v25 = vpack.c.bf16 %v242_v12, %v238_v11  ;;  %v2796_v28 = vsub.f32 %v180_v8, %v242_v12  ;;  %v1033_v30 = vand.u32 4294901760, %v182_v14  ;;  %v244_v31 = vand.u32 4294901760, %v185_v15  ;;  %v188_v32 = vld [vmem:[%s3744_s1 + $0x60] sm:$0xff]  ;;  %v190_v38 = vld [vmem:[%s3744_s1 + $0x70] sm:$0xff]  ;;  %v197_v44 = vld [vmem:[%s3744_s1 + $0xa8] sm:$0xff] }
  0x13   : > { %2411 = vmatprep.subr.bf16.mxu0 %v2761_v16  ;;  %2483 = vmatprep.subr.bf16.mxu1 %v2778_v23  ;;  %v248_v33 = vand.u32 4294901760, %v189_v20  ;;  %v1035_v34 = vand.u32 4294901760, %v187_v21  ;;  %v1039_v35 = vand.u32 4294901760, %v191_v22  ;;  %v246_v36 = vand.u32 4294901760, %v184_v27  ;;  %v195_v45 = vld [vmem:[%s3744_s1 + $0x98] sm:$0xff]  ;;  %v192_v59 = vld [vmem:[%s3744_s1 + $0x80] sm:$0xff]  ;;  %s2874_s16 = scalar_lea.vmem %s3743_s0, %s2674_s30 }
  0x14   : > { %2413 = vmatpush1.bf16.msra.mxu0 %v2782_v25  ;;  %v2809_v39 = vpack.c.bf16 %v1033_v30, %v1029_v29  ;;  %v2811_v40 = vsub.f32 %v178_v13, %v1029_v29  ;;  %v2813_v41 = vsub.f32 %v182_v14, %v1033_v30  ;;  %v2815_v42 = vsub.f32 %v185_v15, %v244_v31  ;;  %v199_v50 = vld [vmem:[%s3744_s1 + $0xb8] sm:$0xff]  ;;  %v196_v0 = vld [vmem:[%s3744_s1 + $0xa0] sm:$0xff]  ;;  %v194_v1 = vld [vmem:[%s3744_s1 + $0x90] sm:$0xff] }
  0x15   : > { %v2826_v46 = vpack.c.bf16 %v248_v33, %v244_v31  ;;  %v2828_v47 = vsub.f32 %v189_v20, %v248_v33  ;;  %v2830_v48 = vpack.c.bf16 %v1039_v35, %v1035_v34  ;;  %v2832_v49 = vsub.f32 %v187_v21, %v1035_v34  ;;  %v198_v2 = vld [vmem:[%s3744_s1 + $0xb0] sm:$0xff]  ;;  %v171_v29 = vld [vmem:[%s2874_s16] sm:$0xff] }
  0x16   : > { %2485 = vmatpush1.bf16.msra.mxu1 %v2809_v39  ;;  %v2839_v51 = vsub.f32 %v191_v22, %v1039_v35  ;;  %v250_v52 = vand.u32 4294901760, %v188_v32  ;;  %v2841_v53 = vsub.f32 %v184_v27, %v246_v36  ;;  %v1037_v54 = vand.u32 4294901760, %v186_v37 }
  0x17   : > { %2415 = vmatprep.subr.bf16.mxu0 %v2826_v46  ;;  %2487 = vmatprep.subr.bf16.mxu1 %v2830_v48  ;;  %v1041_v55 = vand.u32 4294901760, %v190_v38  ;;  %v252_v56 = vand.u32 4294901760, %v193_v43  ;;  %v256_v57 = vand.u32 4294901760, %v197_v44  ;;  %v1043_v58 = vand.u32 4294901760, %v195_v45 }
  0x18   : > { %v2848_v60 = vpack.c.bf16 %v250_v52, %v246_v36  ;;  %v2850_v61 = vsub.f32 %v188_v32, %v250_v52  ;;  %v2852_v62 = vsub.f32 %v186_v37, %v1037_v54  ;;  %v1047_v63 = vand.u32 4294901760, %v199_v50 }
  0x19   : > { %v2863_v3 = vpack.c.bf16 %v1041_v55, %v1037_v54  ;;  %v2865_v4 = vsub.f32 %v190_v38, %v1041_v55  ;;  %v2867_v5 = vpack.c.bf16 %v256_v57, %v252_v56  ;;  %v2869_v6 = vsub.f32 %v193_v43, %v252_v56  ;;  %v172_v56 = vld [vmem:[%s2874_s16 + $0x8] sm:$0xff] }
  0x1a   : > { %2417 = vmatpush1.bf16.msra.mxu0 %v2848_v60  ;;  %v2877_v7 = vsub.f32 %v197_v44, %v256_v57  ;;  %v2879_v8 = vpack.c.bf16 %v1047_v63, %v1043_v58  ;;  %v2881_v10 = vsub.f32 %v195_v45, %v1043_v58  ;;  %v2883_v11 = vsub.f32 %v199_v50, %v1047_v63 }
  0x1b   : > { %2489 = vmatpush1.bf16.msra.mxu1 %v2863_v3  ;;  %2419 = vmatprep.subr.bf16.mxu0 %v2867_v5  ;;  %v254_v12 = vand.u32 4294901760, %v192_v59  ;;  %v258_v13 = vand.u32 4294901760, %v196_v0  ;;  %v1045_v14 = vand.u32 4294901760, %v194_v1  ;;  %v1049_v15 = vand.u32 4294901760, %v198_v2 }
  0x1c   : > { %2491 = vmatprep.subr.bf16.mxu1 %v2879_v8  ;;  %v3765_v20 = vand.u32 4294901760, %v2763_v17  ;;  %v3763_v21 = vand.u32 4294901760, %v2765_v18  ;;  %v3756_v22 = vand.u32 4294901760, %v2767_v19  ;;  %v3755_v27 = vand.u32 4294901760, %v2780_v24 }
  0x1d   : > { %v2893_v30 = vpack.c.bf16 %v258_v13, %v254_v12  ;;  %v2895_v31 = vsub.f32 %v192_v59, %v254_v12  ;;  %v2897_v32 = vsub.f32 %v196_v0, %v258_v13  ;;  %v2899_v33 = vpack.c.bf16 %v1049_v15, %v1045_v14 }
  0x1e   : > { %v2901_v34 = vsub.f32 %v194_v1, %v1045_v14  ;;  %v2903_v35 = vsub.f32 %v198_v2, %v1049_v15  ;;  %v371_v36 = vsub.f32 %v2763_v17, %v3765_v20  ;;  %v383_v37 = vsub.f32 %v2765_v18, %v3763_v21 }
  0x1f   : > { %3786 = vst [vmem:[#allocation2_spill] sm:$0xff] %v2893_v30  ;;  %3787 = vst [vmem:[#allocation3_spill] sm:$0xff] %v2899_v33  ;;  %2421 = vmatpush1.bf16.msra.mxu0 %v2893_v30  ;;  %2493 = vmatpush1.bf16.msra.mxu1 %v2899_v33  ;;  %v1162_v38 = vsub.f32 %v2767_v19, %v3756_v22  ;;  %v1174_v43 = vsub.f32 %v2780_v24, %v3755_v27  ;;  %v222_v44 = vsel %vm220_vm0, %v171_v29, 0  ;;  %v3793_v30 = vmov 0.0  }
  0x20   : > { %v3751_v45 = vand.u32 4294901760, %v2784_v26  ;;  %v372_v50 = vand.u32 4294901760, %v371_v36  ;;  %v384_v52 = vand.u32 4294901760, %v383_v37  ;;  %v2921_v54 = vand.u32 4294901760, %v222_v44 }
  0x21   : > { %v3750_v55 = vand.u32 4294901760, %v2796_v28  ;;  %v1163_v57 = vand.u32 4294901760, %v1162_v38  ;;  %v1175_v58 = vand.u32 4294901760, %v1174_v43  ;;  %v3748_v63 = vand.u32 4294901760, %v2811_v40 }
  0x22   : > { %v377_v59 = vsub.f32 %v2784_v26, %v3751_v45  ;;  %v2422_v0 = vpack.c.bf16 %v384_v52, %v372_v50  ;;  %v2930_v1 = vsub.f32 %v222_v44, %v2921_v54  ;;  %v3747_v12 = vand.u32 4294901760, %v2813_v41 }
  0x23   : > { %v389_v2 = vsub.f32 %v2796_v28, %v3750_v55  ;;  %v2494_v13 = vpack.c.bf16 %v1175_v58, %v1163_v57  ;;  %v1168_v15 = vsub.f32 %v2811_v40, %v3748_v63  ;;  %v225_v29 = vsel %vm220_vm0, %v172_v56, 0  ;;  %v173_v63 = vld [vmem:[%s2874_s16 + $0x10] sm:$0xff] }
  0x24   : > { %v378_v14 = vand.u32 4294901760, %v377_v59  ;;  %2423 = vmatprep.subr.bf16.mxu0 %v2422_v0  ;;  %v2941_v36 = vand.u32 4294901760, %v2930_v1  ;;  %v1180_v38 = vsub.f32 %v2813_v41, %v3747_v12  ;;  %v2946_v43 = vand.u32 4294901760, %v225_v29 }
  0x25   : > { %v390_v37 = vand.u32 4294901760, %v389_v2  ;;  %2495 = vmatprep.subr.bf16.mxu1 %v2494_v13  ;;  %v1169_v44 = vand.u32 4294901760, %v1168_v15  ;;  %v3749_v50 = vand.u32 4294901760, %v2815_v42  ;;  %v3752_v52 = vand.u32 4294901760, %v2828_v47 }
  0x26   : > { %3788 = vst [vmem:[#allocation4_spill] sm:$0xff] %v2941_v36  ;;  %v3753_v56 = vand.u32 4294901760, %v2832_v49  ;;  %v316_v57 = vsub.f32 %v2930_v1, %v2941_v36  ;;  %v1181_v59 = vand.u32 4294901760, %v1180_v38  ;;  %v2954_v0 = vsub.f32 %v225_v29, %v2946_v43 }
  0x27   : > { %v2424_v58 = vpack.c.bf16 %v390_v37, %v378_v14  ;;  %v395_v2 = vsub.f32 %v2815_v42, %v3749_v50  ;;  %v407_v13 = vsub.f32 %v2828_v47, %v3752_v52  ;;  %v3754_v12 = vand.u32 4294901760, %v2839_v51 }
  0x28   : > { %v1186_v15 = vsub.f32 %v2832_v49, %v3753_v56  ;;  %v317_v14 = vand.u32 4294901760, %v316_v57  ;;  %v2496_v37 = vpack.c.bf16 %v1181_v59, %v1169_v44  ;;  %v2967_v29 = vand.u32 4294901760, %v2954_v0 }
  0x29   : > { %v3757_v38 = vand.u32 4294901760, %v2841_v53  ;;  %v396_v50 = vand.u32 4294901760, %v395_v2  ;;  %v408_v55 = vand.u32 4294901760, %v407_v13  ;;  %v1198_v52 = vsub.f32 %v2839_v51, %v3754_v12  ;;  %v174_v2 = vld [vmem:[%s2874_s16 + $0x18] sm:$0xff] }
  0x2a   : > { %3789 = vst [vmem:[#allocation5_spill] sm:$0xff] %v2967_v29  ;;  %v1187_v45 = vand.u32 4294901760, %v1186_v15  ;;  %318 = vmatmul.mubr.f32.vlgmr.msra.gmra.mrb[0].mxu0 %v317_v14  ;;  %1109 = vmatmul.mubr.f32.vlgmr.msra.gmra.mrb[0].mxu1 %v317_v14  ;;  %v327_v56 = vsub.f32 %v2954_v0, %v2967_v29  ;;  %v3758_v57 = vand.u32 4294901760, %v2850_v61  ;;  %v3762_v59 = vand.u32 4294901760, %v2852_v62 }
  0x2b   : > { %v401_v44 = vsub.f32 %v2841_v53, %v3757_v38  ;;  %2425 = vmatpush1.bf16.msra.mxu0 %v2424_v58  ;;  %2497 = vmatpush1.bf16.msra.mxu1 %v2496_v37  ;;  %v2426_v13 = vpack.c.bf16 %v408_v55, %v396_v50  ;;  %v1199_v15 = vand.u32 4294901760, %v1198_v52  ;;  %v3759_v12 = vand.u32 4294901760, %v2865_v4 }
  0x2c   : > { %v228_v14 = vsel %vm220_vm0, %v173_v63, 0  ;;  %323 = vmatprep.mubr.f32.mxu0 %v3766_v9  ;;  %1114 = vmatprep.mubr.f32.mxu1 %v3766_v9  ;;  %v328_v27 = vand.u32 4294901760, %v327_v56  ;;  %v413_v38 = vsub.f32 %v2850_v61, %v3758_v57  ;;  %v1192_v58 = vsub.f32 %v2852_v62, %v3762_v59 }
  0x2d   : > { %v402_v22 = vand.u32 4294901760, %v401_v44  ;;  %2427 = vmatprep.subr.bf16.mxu0 %v2426_v13  ;;  %v2498_v55 = vpack.c.bf16 %v1199_v15, %v1187_v45  ;;  %v1204_v63 = vsub.f32 %v2865_v4, %v3759_v12  ;;  %v2995_v50 = vand.u32 4294901760, %v228_v14 }
  0x2e   : > { %v231_v52 = vsel %vm220_vm0, %v174_v2, 0  ;;  %329 = vmatmul.mubr.f32.gmra.mrb[2].mxu0 %v328_v27  ;;  %1120 = vmatmul.mubr.f32.gmra.mrb[2].mxu1 %v328_v27  ;;  %v414_v56 = vand.u32 4294901760, %v413_v38  ;;  %v1193_v37 = vand.u32 4294901760, %v1192_v58  ;;  %v3761_v57 = vand.u32 4294901760, %v2869_v6 }
  0x2f   : > { %v2998_v44 = vand.u32 4294901760, %v231_v52  ;;  %2499 = vmatprep.subr.bf16.mxu1 %v2498_v55  ;;  %334 = vmatprep.mubr.f32.mxu0 %v3766_v9  ;;  %v1205_v45 = vand.u32 4294901760, %v1204_v63  ;;  %v3003_v13 = vsub.f32 %v228_v14, %v2995_v50  ;;  %v3760_v15 = vand.u32 4294901760, %v2877_v7 }
  0x30   : > { %v3764_v12 = vand.u32 4294901760, %v2881_v10  ;;  %v2428_v2 = vpack.c.bf16 %v414_v56, %v402_v22  ;;  %1125 = vmatprep.mubr.f32.mxu1 %v3766_v9  ;;  %v419_v38 = vsub.f32 %v2869_v6, %v3761_v57  ;;  %v3768_v58 = vand.u32 4294901760, %v2883_v11  ;;  %v175_v9 = vld [vmem:[%s2874_s16 + $0x20] sm:$0xff] }
  0x31   : > { %v3009_v27 = vsub.f32 %v231_v52, %v2998_v44  ;;  %v2500_v55 = vpack.c.bf16 %v1205_v45, %v1193_v37  ;;  %v3016_v14 = vand.u32 4294901760, %v3003_v13  ;;  %v431_v63 = vsub.f32 %v2877_v7, %v3760_v15 }
  0x32   : > { %v1210_v22 = vsub.f32 %v2881_v10, %v3764_v12  ;;  %2429 = vmatpush1.bf16.msra.mxu0 %v2428_v2  ;;  %v420_v56 = vand.u32 4294901760, %v419_v38  ;;  %v1222_v37 = vsub.f32 %v2883_v11, %v3768_v58  ;;  %v424_v45 = vand.u32 4294901760, %v2895_v31 }
  0x33   : > { %3790 = vst [vmem:[#allocation6_spill] sm:$0xff] %v3009_v27  ;;  %3791 = vst [vmem:[#allocation7_spill] sm:$0xff] %v3016_v14  ;;  %v3025_v52 = vand.u32 4294901760, %v3009_v27  ;;  %2501 = vmatpush1.bf16.msra.mxu1 %v2500_v55  ;;  %v338_v15 = vsub.f32 %v3003_v13, %v3016_v14  ;;  %v432_v57 = vand.u32 4294901760, %v431_v63  ;;  %v436_v21 = vand.u32 4294901760, %v2897_v32 }
  0x34   : > { %v1211_v59 = vand.u32 4294901760, %v1210_v22  ;;  %v1223_v12 = vand.u32 4294901760, %v1222_v37  ;;  %v425_v38 = vsub.f32 %v2895_v31, %v424_v45  ;;  %v1215_v20 = vand.u32 4294901760, %v2901_v34 }
  0x35   : > { %3792 = vst [vmem:[#allocation8_spill] sm:$0xff] %v3025_v52  ;;  %v349_v2 = vsub.f32 %v3009_v27, %v3025_v52  ;;  %v339_v58 = vand.u32 4294901760, %v338_v15  ;;  %v2430_v29 = vpack.c.bf16 %v432_v57, %v420_v56  ;;  %v437_v55 = vsub.f32 %v2897_v32, %v436_v21 }
  0x36   : > { %v1227_v36 = vand.u32 4294901760, %v2903_v35  ;;  %v2502_v14 = vpack.c.bf16 %v1223_v12, %v1211_v59  ;;  %v426_v63 = vand.u32 4294901760, %v425_v38  ;;  %v1216_v22 = vsub.f32 %v2901_v34, %v1215_v20 }
  0x37   : > { %340 = vmatmul.mubr.f32.gmra.mrb[4].mxu0 %v339_v58  ;;  %1131 = vmatmul.mubr.f32.gmra.mrb[4].mxu1 %v339_v58  ;;  %v350_v33 = vand.u32 4294901760, %v349_v2  ;;  %v438_v52 = vand.u32 4294901760, %v437_v55  ;;  %v234_v27 = vsel %vm220_vm0, %v175_v9, 0  ;;  %v2434_v58 = vpack.c.bf16 %v2765_v18, %v2763_v17 }
  0x38   : > { %v1228_v37 = vsub.f32 %v2903_v35, %v1227_v36  ;;  %345 = vmatprep.mubr.f32.mxu0 %v3793_v30  ;;  %1136 = vmatprep.mubr.f32.mxu1 %v3793_v30  ;;  %v1217_v57 = vand.u32 4294901760, %v1216_v22  ;;  %v3046_v15 = vand.u32 4294901760, %v234_v27  ;;  %v2506_v9 = vpack.c.bf16 %v2780_v24, %v2767_v19 }
  0x39   : > { %2431 = vmatprep.subr.bf16.mxu0 %v2430_v29  ;;  %2503 = vmatprep.subr.bf16.mxu1 %v2502_v14  ;;  %v2432_v12 = vpack.c.bf16 %v438_v52, %v426_v63  ;;  %v3795_v14 = vand.u32 4294901760, %v2763_v17  ;;  %v3797_v38 = vand.u32 4294901760, %v2767_v19  ;;  %v3799_v63 = vand.u32 4294901760, %v2784_v26 }
  0x3a   : > { %v1229_v59 = vand.u32 4294901760, %v1228_v37  ;;  %v3049_v56 = vsub.f32 %v234_v27, %v3046_v15  ;;  %v3796_v27 = vand.u32 4294901760, %v2765_v18  ;;  %v3800_v22 = vand.u32 4294901760, %v2796_v28 }
  0x3b   : > { %351 = vmatmul.mubr.f32.gmra.mrb[6].mxu0 %v350_v33  ;;  %1142 = vmatmul.mubr.f32.gmra.mrb[6].mxu1 %v350_v33  ;;  %v3798_v33 = vand.u32 4294901760, %v2780_v24  ;;  %v3801_v17 = vand.u32 4294901760, %v2811_v40  ;;  %v3802_v18 = vand.u32 4294901760, %v2813_v41  ;;  %v3803_v19 = vand.u32 4294901760, %v2815_v42 }
  0x3c   : > { %v2504_v2 = vpack.c.bf16 %v1229_v59, %v1217_v57  ;;  %2433 = vmatpush1.bf16.msra.mxu0 %v2432_v12  ;;  %356 = vmatprep.mubr.f32.mxu0 %v3793_v30  ;;  %v3057_v29 = vand.u32 4294901760, %v3049_v56  ;;  %v3063_v52 = vpack.c.bf16 %v3796_v27, %v3795_v14  ;;  %v3076_v37 = vpack.c.bf16 %v3800_v22, %v3799_v63 }
  0x3d   : > { %1147 = vmatprep.mubr.f32.mxu1 %v3793_v30  ;;  %v3070_v55 = vpack.c.bf16 %v3798_v33, %v3797_v38  ;;  %v3082_v57 = vpack.c.bf16 %v3802_v18, %v3801_v17  ;;  %2435 = vmatprep.subr.bf16.mxu0 %v2434_v58  ;;  %v3804_v24 = vand.u32 4294901760, %v2828_v47  ;;  %v3806_v14 = vand.u32 4294901760, %v2839_v51 }
  0x3e   : > { %3794 = vst [vmem:[#allocation9_spill] sm:$0xff] %v3057_v29  ;;  %2505 = vmatpush1.bf16.msra.mxu1 %v2504_v2  ;;  %v360_v12 = vsub.f32 %v3049_v56, %v3057_v29  ;;  %v3805_v2 = vand.u32 4294901760, %v2832_v49  ;;  %v3807_v38 = vand.u32 4294901760, %v2841_v53  ;;  %v3808_v33 = vand.u32 4294901760, %v2850_v61 }
  0x3f   : > { %2507 = vmatprep.subr.bf16.mxu1 %v2506_v9  ;;  %v3090_v59 = vpack.c.bf16 %v3804_v24, %v3803_v19  ;;  %v3809_v58 = vand.u32 4294901760, %v2852_v62  ;;  %v3810_v9 = vand.u32 4294901760, %v2865_v4  ;;  %v3811_v17 = vand.u32 4294901760, %v2869_v6 }
  0x40   : > { %v3096_v27 = vpack.c.bf16 %v3806_v14, %v3805_v2  ;;  %v3102_v63 = vpack.c.bf16 %v3808_v33, %v3807_v38  ;;  %v3812_v18 = vand.u32 4294901760, %v2877_v7  ;;  %v3813_v24 = vand.u32 4294901760, %v2881_v10 }
  0x41   : > { %v3108_v22 = vpack.c.bf16 %v3810_v9, %v3809_v58  ;;  %v3814_v2 = vand.u32 4294901760, %v2883_v11  ;;  %v361_v38 = vand.u32 4294901760, %v360_v12  ;;  %v3122_v33 = vpack.c.bf16 %v436_v21, %v424_v45 }
  0x42   : > { %v3114_v19 = vpack.c.bf16 %v3812_v18, %v3811_v17  ;;  %v3124_v29 = vpack.c.bf16 %v1227_v36, %v1215_v20  ;;  %v2436_v58 = vpack.c.bf16 %v2796_v28, %v2784_v26  ;;  %v2508_v9 = vpack.c.bf16 %v2813_v41, %v2811_v40 }
  0x43   : > { %v3120_v14 = vpack.c.bf16 %v3814_v2, %v3813_v24  ;;  %362 = vmatmul.mubr.f32.gmra.mrb[8].mxu0 %v361_v38  ;;  %1153 = vmatmul.mubr.f32.gmra.mrb[8].mxu1 %v361_v38  ;;  %v2438_v17 = vpack.c.bf16 %v2828_v47, %v2815_v42  ;;  %v2510_v21 = vpack.c.bf16 %v2839_v51, %v2832_v49  ;;  %v3815_v47 = vld [vmem:[#allocation2_spill] sm:$0xff]  ;;  %v3816_v49 = vld [vmem:[#allocation3_spill] sm:$0xff]  ;;  %vm1978_vm1 = vcmask 949248  }
  0x44   : > { %492 = vmatprep.mubr.f32.mxu0 %v3793_v30  ;;  %1283 = vmatprep.mubr.f32.mxu1 %v3793_v30  ;;  %v2440_v20 = vpack.c.bf16 %v2850_v61, %v2841_v53  ;;  %v2512_v26 = vpack.c.bf16 %v2865_v4, %v2852_v62  ;;  %v2442_v28 = vpack.c.bf16 %v2877_v7, %v2869_v6  ;;  %v3817_v51 = vld [vmem:[#allocation6_spill] sm:$0xff]  ;;  %v3818_v53 = vld [vmem:[#allocation4_spill] sm:$0xff]  ;;  %v3819_v61 = vld [vmem:[#allocation5_spill] sm:$0xff]  ;;  %vm2074_vm2 = vcmask 850944  }
  0x45   : > { %v2514_v40 = vpack.c.bf16 %v2883_v11, %v2881_v10  ;;  %v2444_v41 = vpack.c.bf16 %v2897_v32, %v2895_v31  ;;  %v2516_v42 = vpack.c.bf16 %v2903_v35, %v2901_v34  ;;  %v3820_v62 = vld [vmem:[#allocation7_spill] sm:$0xff]  ;;  %v3821_v4 = vld [vmem:[#allocation8_spill] sm:$0xff]  ;;  %v3822_v6 = vld [vmem:[#allocation9_spill] sm:$0xff]  ;;  %vm2150_vm3 = vcmask 1046528  }
  0x46   : > { %vm2227_vm4 = vcmask 1045504   ;;  %vm2327_vm5 = vcmask 588800   ;;  %vm2344_vm6 = vcmask 586752  }
  0x47   : > { %494 = vmatmul.mubr.f32.vlgmr.msra.gmra.mrb[0].mxu0 %v2921_v54  ;;  %1285 = vmatmul.mubr.f32.vlgmr.msra.gmra.mrb[0].mxu1 %v2921_v54 }
  0x48   : > { %2437 = vmatpush1.bf16.msra.mxu0 %v2436_v58  ;;  %2509 = vmatpush1.bf16.msra.mxu1 %v2508_v9 }
  0x49   : > { %499 = vmatprep.mubr.f32.mxu0 %v3793_v30  ;;  %1290 = vmatprep.mubr.f32.mxu1 %v3793_v30 }
  0x4a   : > { %2439 = vmatprep.subr.bf16.mxu0 %v2438_v17  ;;  %2511 = vmatprep.subr.bf16.mxu1 %v2510_v21 }
  0x4b   : > { %501 = vmatmul.mubr.f32.gmra.mrb[2].mxu0 %v2946_v43  ;;  %1292 = vmatmul.mubr.f32.gmra.mrb[2].mxu1 %v2946_v43 }
  0x4c   : > { %506 = vmatprep.mubr.f32.mxu0 %v3793_v30  ;;  %2441 = vmatpush1.bf16.msra.mxu0 %v2440_v20 }
  0x4d   : > { %1297 = vmatprep.mubr.f32.mxu1 %v3793_v30  ;;  %2513 = vmatpush1.bf16.msra.mxu1 %v2512_v26 }
  0x4e   : > { %2443 = vmatprep.subr.bf16.mxu0 %v2442_v28  ;;  %2515 = vmatprep.subr.bf16.mxu1 %v2514_v40 }
  0x4f   : > { %508 = vmatmul.mubr.f32.gmra.mrb[4].mxu0 %v2995_v50  ;;  %1299 = vmatmul.mubr.f32.gmra.mrb[4].mxu1 %v2995_v50 }
  0x50   : > { %513 = vmatprep.mubr.f32.mxu0 %v3793_v30  ;;  %1304 = vmatprep.mubr.f32.mxu1 %v3793_v30 }
  0x51   : > { %2445 = vmatpush1.bf16.msra.mxu0 %v2444_v41  ;;  %2517 = vmatpush1.bf16.msra.mxu1 %v2516_v42 }
  0x52   : > { %2447 = vmatprep.subr.bf16.mxu0 %v2761_v16  ;;  %2519 = vmatprep.subr.bf16.mxu1 %v2778_v23 }
  0x53   : > { %515 = vmatmul.mubr.f32.gmra.mrb[6].mxu0 %v2998_v44  ;;  %1306 = vmatmul.mubr.f32.gmra.mrb[6].mxu1 %v2998_v44 }
  0x54   : > { %520 = vmatprep.mubr.f32.mxu0 %v3793_v30  ;;  %1311 = vmatprep.mubr.f32.mxu1 %v3793_v30 }
  0x57   : > { %522 = vmatmul.mubr.f32.gmra.mrb[8].mxu0 %v3046_v15  ;;  %1313 = vmatmul.mubr.f32.gmra.mrb[8].mxu1 %v3046_v15 }
  0x58   : > { %616 = vmatprep.mubr.f32.mxu0 %v3793_v30  ;;  %1407 = vmatprep.mubr.f32.mxu1 %v3793_v30 }
  0x5b   : > { %619 = vmatmul.mubr.f32.vlgmr.msra.gmra.mrb[0].mxu0 %v2930_v1  ;;  %1410 = vmatmul.mubr.f32.vlgmr.msra.gmra.mrb[0].mxu1 %v2930_v1 }
  0x5c   : > { %2449 = vmatpush1.bf16.msra.mxu0 %v2782_v25  ;;  %2521 = vmatpush1.bf16.msra.mxu1 %v2809_v39 }
  0x5d   : > { %624 = vmatprep.mubr.f32.mxu0 %v3793_v30  ;;  %1415 = vmatprep.mubr.f32.mxu1 %v3793_v30 }
  0x5e   : > { %2451 = vmatprep.subr.bf16.mxu0 %v2826_v46  ;;  %2523 = vmatprep.subr.bf16.mxu1 %v2830_v48 }
  0x5f   : > { %627 = vmatmul.mubr.f32.gmra.mrb[2].mxu0 %v2954_v0  ;;  %1418 = vmatmul.mubr.f32.gmra.mrb[2].mxu1 %v2954_v0 }
  0x60   : > { %632 = vmatprep.mubr.f32.mxu0 %v3793_v30  ;;  %2453 = vmatpush1.bf16.msra.mxu0 %v2848_v60 }
  0x61   : > { %1423 = vmatprep.mubr.f32.mxu1 %v3793_v30  ;;  %2525 = vmatpush1.bf16.msra.mxu1 %v2863_v3 }
  0x62   : > { %2455 = vmatprep.subr.bf16.mxu0 %v2867_v5  ;;  %2527 = vmatprep.subr.bf16.mxu1 %v2879_v8 }
  0x63   : > { %635 = vmatmul.mubr.f32.gmra.mrb[4].mxu0 %v3003_v13  ;;  %1426 = vmatmul.mubr.f32.gmra.mrb[4].mxu1 %v3003_v13 }
  0x64   : > { %640 = vmatprep.mubr.f32.mxu0 %v3793_v30  ;;  %1431 = vmatprep.mubr.f32.mxu1 %v3793_v30 }
  0x65   : > { %2457 = vmatpush1.bf16.msra.mxu0 %v3815_v47  ;;  %2529 = vmatpush1.bf16.msra.mxu1 %v3816_v49 }
  0x66   : > { %2459 = vmatprep.subr.bf16.mxu0 %v3063_v52  ;;  %2531 = vmatprep.subr.bf16.mxu1 %v3070_v55 }
  0x67   : > { %643 = vmatmul.mubr.f32.gmra.mrb[6].mxu0 %v3817_v51  ;;  %1434 = vmatmul.mubr.f32.gmra.mrb[6].mxu1 %v3817_v51 }
  0x68   : > { %648 = vmatprep.mubr.f32.mxu0 %v3793_v30  ;;  %1439 = vmatprep.mubr.f32.mxu1 %v3793_v30 }
  0x6b   : > { %651 = vmatmul.mubr.f32.gmra.mrb[8].mxu0 %v3049_v56  ;;  %1442 = vmatmul.mubr.f32.gmra.mrb[8].mxu1 %v3049_v56 }
  0x6c   : > { %733 = vmatprep.mubr.f32.mxu0 %v3793_v30  ;;  %1524 = vmatprep.mubr.f32.mxu1 %v3793_v30 }
  0x6f   : > { %737 = vmatmul.mubr.f32.vlgmr.msra.gmra.mrb[0].mxu0 %v3818_v53  ;;  %1528 = vmatmul.mubr.f32.vlgmr.msra.gmra.mrb[0].mxu1 %v3818_v53 }
  0x70   : > { %2461 = vmatpush1.bf16.msra.mxu0 %v3076_v37  ;;  %2533 = vmatpush1.bf16.msra.mxu1 %v3082_v57 }
  0x71   : > { %742 = vmatprep.mubr.f32.mxu0 %v3793_v30  ;;  %1533 = vmatprep.mubr.f32.mxu1 %v3793_v30 }
  0x72   : > { %2463 = vmatprep.subr.bf16.mxu0 %v3090_v59  ;;  %2535 = vmatprep.subr.bf16.mxu1 %v3096_v27  ;;  %v206_v27 = vld [vmem:[%s3745_s2 + $0x30] sm:$0xff] }
  0x73   : > { %746 = vmatmul.mubr.f32.gmra.mrb[2].mxu0 %v3819_v61  ;;  %1537 = vmatmul.mubr.f32.gmra.mrb[2].mxu1 %v3819_v61 }
  0x74   : > { %751 = vmatprep.mubr.f32.mxu0 %v3793_v30  ;;  %2465 = vmatpush1.bf16.msra.mxu0 %v3102_v63 }
  0x75   : > { %1542 = vmatprep.mubr.f32.mxu1 %v3793_v30  ;;  %2537 = vmatpush1.bf16.msra.mxu1 %v3108_v22 }
  0x76   : > { %2467 = vmatprep.subr.bf16.mxu0 %v3114_v19  ;;  %2539 = vmatprep.subr.bf16.mxu1 %v3120_v14 }
  0x77   : > { %755 = vmatmul.mubr.f32.gmra.mrb[4].mxu0 %v3820_v62  ;;  %1546 = vmatmul.mubr.f32.gmra.mrb[4].mxu1 %v3820_v62 }
  0x78   : > { %760 = vmatprep.mubr.f32.mxu0 %v3793_v30  ;;  %1551 = vmatprep.mubr.f32.mxu1 %v3793_v30 }
  0x79   : > { %2469 = vmatpush1.bf16.msra.mxu0 %v3122_v33  ;;  %2541 = vmatpush1.bf16.msra.mxu1 %v3124_v29  ;;  %v207_v29 = vld [vmem:[%s3745_s2 + $0x38] sm:$0xff] }
  0x7a   : > { %2471 = vmatprep.subr.bf16.mxu0 %v2761_v16  ;;  %2543 = vmatprep.subr.bf16.mxu1 %v2778_v23  ;;  %v200_v16 = vld [vmem:[%s3745_s2] sm:$0xff]  ;;  %v202_v23 = vld [vmem:[%s3745_s2 + $0x10] sm:$0xff] }
  0x7b   : > { %764 = vmatmul.mubr.f32.gmra.mrb[6].mxu0 %v3821_v4  ;;  %1555 = vmatmul.mubr.f32.gmra.mrb[6].mxu1 %v3821_v4 }
  0x7c   : > { %769 = vmatprep.mubr.f32.mxu0 %v3793_v30  ;;  %1560 = vmatprep.mubr.f32.mxu1 %v3793_v30 }
  0x7f   : > { %773 = vmatmul.mubr.f32.gmra.mrb[8].mxu0 %v3822_v6  ;;  %1564 = vmatmul.mubr.f32.gmra.mrb[8].mxu1 %v3822_v6 }
  0x80   : > { %879 = vmatprep.mubr.f32.mxu0 %v3793_v30  ;;  %1670 = vmatprep.mubr.f32.mxu1 %v3793_v30 }
  0x83   : > { %881 = vmatmul.mubr.f32.vlgmr.msra.gmra.mrb[0].mxu0 %v2921_v54  ;;  %1672 = vmatmul.mubr.f32.vlgmr.msra.gmra.mrb[0].mxu1 %v2921_v54 }
  0x84   : > { %2473 = vmatpush1.bf16.msra.mxu0 %v2782_v25  ;;  %2545 = vmatpush1.bf16.msra.mxu1 %v2809_v39  ;;  %v201_v25 = vld [vmem:[%s3745_s2 + $0x8] sm:$0xff]  ;;  %v203_v39 = vld [vmem:[%s3745_s2 + $0x18] sm:$0xff] }
  0x85   : > { %886 = vmatprep.mubr.f32.mxu0 %v3793_v30  ;;  %1677 = vmatprep.mubr.f32.mxu1 %v3793_v30 }
  0x86   : > { %2475 = vmatprep.subr.bf16.mxu0 %v2826_v46  ;;  %2547 = vmatprep.subr.bf16.mxu1 %v2830_v48 }
  0x87   : > { %888 = vmatmul.mubr.f32.gmra.mrb[2].mxu0 %v2946_v43  ;;  %1679 = vmatmul.mubr.f32.gmra.mrb[2].mxu1 %v2946_v43 }
  0x88   : > { %893 = vmatprep.mubr.f32.mxu0 %v3793_v30  ;;  %2477 = vmatpush1.bf16.msra.mxu0 %v2848_v60 }
  0x89   : > { %1684 = vmatprep.mubr.f32.mxu1 %v3793_v30  ;;  %2549 = vmatpush1.bf16.msra.mxu1 %v2863_v3 }
  0x8a   : > { %2479 = vmatprep.subr.bf16.mxu0 %v2867_v5  ;;  %2551 = vmatprep.subr.bf16.mxu1 %v2879_v8 }
  0x8b   : > { %895 = vmatmul.mubr.f32.gmra.mrb[4].mxu0 %v2995_v50  ;;  %1686 = vmatmul.mubr.f32.gmra.mrb[4].mxu1 %v2995_v50 }
  0x8c   : > { %900 = vmatprep.mubr.f32.mxu0 %v3793_v30  ;;  %1691 = vmatprep.mubr.f32.mxu1 %v3793_v30 }
  0x8d   : > { %2481 = vmatpush1.bf16.msra.mxu0 %v3815_v47  ;;  %2553 = vmatpush1.bf16.msra.mxu1 %v3816_v49 }
  0x8f   : > { %902 = vmatmul.mubr.f32.gmra.mrb[6].mxu0 %v2998_v44  ;;  %1693 = vmatmul.mubr.f32.gmra.mrb[6].mxu1 %v2998_v44 }
  0x90   : > { %907 = vmatprep.mubr.f32.mxu0 %v3793_v30  ;;  %1698 = vmatprep.mubr.f32.mxu1 %v3793_v30 }
  0x93   : > { %909 = vmatmul.mubr.f32.gmra.mrb[8].mxu0 %v3046_v15  ;;  %1700 = vmatmul.mubr.f32.gmra.mrb[8].mxu1 %v3046_v15 }
  0x94   : > { %991 = vmatprep.mubr.f32.mxu0 %v3793_v30  ;;  %1782 = vmatprep.mubr.f32.mxu1 %v3793_v30 }
  0x97   : > { %993 = vmatmul.mubr.f32.vlgmr.msra.gmra.mrb[0].mxu0 %v2921_v54  ;;  %1784 = vmatmul.mubr.f32.vlgmr.msra.gmra.mrb[0].mxu1 %v2921_v54  ;;  %v205_v54 = vld [vmem:[%s3745_s2 + $0x28] sm:$0xff] }
  0x98   : > { %998 = vmatprep.mubr.f32.mxu0 %v3793_v30  ;;  %1789 = vmatprep.mubr.f32.mxu1 %v3793_v30 }
  0x9b   : > { %1000 = vmatmul.mubr.f32.gmra.mrb[2].mxu0 %v2946_v43  ;;  %1791 = vmatmul.mubr.f32.gmra.mrb[2].mxu1 %v2946_v43  ;;  %v204_v43 = vld [vmem:[%s3745_s2 + $0x20] sm:$0xff] }
  0x9c   : > { %1005 = vmatprep.mubr.f32.mxu0 %v3793_v30  ;;  %1796 = vmatprep.mubr.f32.mxu1 %v3793_v30 }
  0x9f   : > { %1007 = vmatmul.mubr.f32.gmra.mrb[4].mxu0 %v2995_v50  ;;  %1798 = vmatmul.mubr.f32.gmra.mrb[4].mxu1 %v2995_v50 }
  0xa0   : > { %1012 = vmatprep.mubr.f32.mxu0 %v3793_v30  ;;  %1803 = vmatprep.mubr.f32.mxu1 %v3793_v30 }
  0xa3   : > { %1014 = vmatmul.mubr.f32.gmra.mrb[6].mxu0 %v2998_v44  ;;  %1805 = vmatmul.mubr.f32.gmra.mrb[6].mxu1 %v2998_v44 }
  0xa4   : > { %1019 = vmatprep.mubr.f32.mxu0 %v3793_v30  ;;  %1810 = vmatprep.mubr.f32.mxu1 %v3793_v30 }
  0xa7   : > { %1021 = vmatmul.mubr.f32.gmra.mrb[8].mxu0 %v3046_v15  ;;  %1812 = vmatmul.mubr.f32.gmra.mrb[8].mxu1 %v3046_v15 }
 0x16a   : > { %v994_v46 = vpop.f32.mrb[0].mxu0  ;;  %v1785_v48 = vpop.f32.mrb[0].mxu1 }
 0x16b   : > { %v2554_v60 = vadd.f32 %v994_v46, %v200_v16  ;;  %v2564_v3 = vadd.f32 %v1785_v48, %v202_v23  ;;  %v996_v5 = vpop.f32.mrb[1].mxu0  ;;  %v1787_v7 = vpop.f32.mrb[1].mxu1 }
 0x16c   : > { %v2555_v8 = vadd.f32 %v996_v5, %v201_v25  ;;  %v2565_v10 = vadd.f32 %v1787_v7, %v203_v39  ;;  %v209_v25 = vld [vmem:[%s3745_s2 + $0x48] sm:$0xff]  ;;  %v208_v39 = vld [vmem:[%s3745_s2 + $0x40] sm:$0xff] }
 0x16d   : > { %v1818_v11 = vadd.f32 16.0, %v2554_v60  ;;  %v1820_v30 = vadd.f32 16.0, %v2564_v3 }
 0x16e   : > { %v1819_v31 = vadd.f32 16.0, %v2555_v8  ;;  %v1821_v32 = vadd.f32 16.0, %v2565_v10  ;;  %v1001_v34 = vpop.f32.mrb[2].mxu0  ;;  %v1792_v35 = vpop.f32.mrb[2].mxu1 }
 0x16f   : > { %v1838_v1 = vmax.f32 %v1818_v11, 0.0  ;;  %v1840_v36 = vmax.f32 %v1820_v30, 0.0  ;;  %v1003_v0 = vpop.f32.mrb[3].mxu0  ;;  %v1794_v50 = vpop.f32.mrb[3].mxu1  ;;  %v2556_v55 = vadd.f32 %v1001_v34, %v204_v43  ;;  %v2566_v58 = vadd.f32 %v1792_v35, %v206_v27 }
 0x170   : > { %v1839_v44 = vmax.f32 %v1819_v31, 0.0  ;;  %v1841_v13 = vmax.f32 %v1821_v32, 0.0  ;;  %v2557_v56 = vadd.f32 %v1003_v0, %v205_v54  ;;  %v2567_v19 = vadd.f32 %v1794_v50, %v207_v29 }
 0x171   : > { %v1858_v45 = vmin.f32 %v1838_v1, 32.0  ;;  %v1860_v15 = vmin.f32 %v1840_v36, 32.0  ;;  %v1822_v33 = vadd.f32 16.0, %v2556_v55  ;;  %v1824_v47 = vadd.f32 16.0, %v2566_v58 }
 0x172   : > { %v1861_v52 = vmin.f32 %v1841_v13, 32.0  ;;  %v1008_v37 = vpop.f32.mrb[4].mxu0  ;;  %v1799_v57 = vpop.f32.mrb[4].mxu1  ;;  %v1859_v18 = vmin.f32 %v1839_v44, 32.0  ;;  %v1823_v38 = vadd.f32 16.0, %v2557_v56  ;;  %v1825_v41 = vadd.f32 16.0, %v2567_v19 }
 0x173   : > { %v1878_v12 = vmul.f32 %v2554_v60, %v1858_v45  ;;  %v1880_v59 = vmul.f32 %v2564_v3, %v1860_v15  ;;  %v1010_v63 = vpop.f32.mrb[5].mxu0  ;;  %v1801_v22 = vpop.f32.mrb[5].mxu1  ;;  %v1842_v42 = vmax.f32 %v1822_v33, 0.0  ;;  %v1844_v23 = vmax.f32 %v1824_v47, 0.0 }
 0x174   : > { %v1881_v14 = vmul.f32 %v2565_v10, %v1861_v52  ;;  %v1879_v26 = vmul.f32 %v2555_v8, %v1859_v18  ;;  %v1843_v40 = vmax.f32 %v1823_v38, 0.0  ;;  %v1845_v6 = vmax.f32 %v1825_v41, 0.0  ;;  %v211_v8 = vld [vmem:[%s3745_s2 + $0x58] sm:$0xff]  ;;  %v210_v10 = vld [vmem:[%s3745_s2 + $0x50] sm:$0xff]  ;;  %v213_v52 = vld [vmem:[%s3745_s2 + $0x68] sm:$0xff] }
 0x175   : > { %v3306_v24 = vmul.f32 0.03125, %v1878_v12  ;;  %v3308_v2 = vmul.f32 0.03125, %v1880_v59  ;;  %v1862_v16 = vmin.f32 %v1842_v42, 32.0  ;;  %v2559_v60 = vadd.f32 %v1010_v63, %v209_v25  ;;  %v214_v18 = vld [vmem:[%s3745_s2 + $0x70] sm:$0xff]  ;;  %v217_v25 = vld [vmem:[%s3745_s2 + $0x88] sm:$0xff] }
 0x176   : > { %v3310_v9 = vpop.f32.mrb[6].mxu0  ;;  %v3312_v17 = vpop.f32.mrb[6].mxu1  ;;  %v3320_v28 = vmul.f32 0.03125, %v1881_v14  ;;  %v3334_v62 = vmul.f32 0.03125, %v1879_v26  ;;  %v1863_v4 = vmin.f32 %v1843_v40, 32.0  ;;  %v1865_v48 = vmin.f32 %v1845_v6, 32.0 }
 0x177   : > { %v3314_v21 = vpop.f32.mrb[7].mxu1  ;;  %1942 = vrot.lane.b32.xlu1 %v3308_v2, %s2696_s6  ;;  %v1017_v20 = vpop.f32.mrb[7].mxu0  ;;  %1938 = vrot.lane.b32.xlu0 %v3306_v24, %s2696_s6  ;;  %v1882_v3 = vmul.f32 %v2556_v55, %v1862_v16  ;;  %v1864_v5 = vmin.f32 %v1844_v23, 32.0  ;;  %v2558_v7 = vadd.f32 %v1008_v37, %v208_v39  ;;  %v1827_v31 = vadd.f32 16.0, %v2559_v60  ;;  %v212_v55 = vld [vmem:[%s3745_s2 + $0x60] sm:$0xff] }
 0x178   : > { %v1883_v46 = vmul.f32 %v2557_v56, %v1863_v4  ;;  %v1885_v30 = vmul.f32 %v2567_v19, %v1865_v48  ;;  %v2569_v32 = vadd.f32 %v1801_v22, %v211_v8  ;;  %v2568_v1 = vadd.f32 %v1799_v57, %v210_v10  ;;  %v215_v22 = vld [vmem:[%s3745_s2 + $0x78] sm:$0xff]  ;;  %v216_v39 = vld [vmem:[%s3745_s2 + $0x80] sm:$0xff]  ;;  %v218_v10 = vld [vmem:[%s3745_s2 + $0x90] sm:$0xff] }
 0x179   : > { %v3358_v34 = vmul.f32 0.03125, %v1882_v3  ;;  %v1884_v35 = vmul.f32 %v2566_v58, %v1864_v5  ;;  %v1826_v54 = vadd.f32 16.0, %v2558_v7  ;;  %v1847_v43 = vmax.f32 %v1827_v31, 0.0  ;;  %v219_v8 = vld [vmem:[%s3745_s2 + $0x98] sm:$0xff] }
 0x17a   : > { %v3322_v49 = vpop.f32.mrb[8].mxu0  ;;  %v3324_v51 = vpop.f32.mrb[8].mxu1  ;;  %v3356_v11 = vmul.f32 0.03125, %v1883_v46  ;;  %v3364_v36 = vmul.f32 0.03125, %v1885_v30  ;;  %v1829_v0 = vadd.f32 16.0, %v2569_v32  ;;  %v1828_v13 = vadd.f32 16.0, %v2568_v1 }
 0x17b   : > { %v3326_v53 = vpop.f32.mrb[9].mxu1  ;;  %1944 = vrot.lane.b32.xlu1 %v3320_v28, %s2696_s6  ;;  %v3330_v61 = vpop.f32.mrb[9].mxu0  ;;  %2034 = vrot.lane.b32.xlu0 %v3306_v24, %s2697_s7  ;;  %v3366_v50 = vmul.f32 0.03125, %v1884_v35  ;;  %v1846_v44 = vmax.f32 %v1826_v54, 0.0  ;;  %v1867_v45 = vmin.f32 %v1847_v43, 32.0  ;;  %v2561_v12 = vadd.f32 %v1017_v20, %v213_v52 }
 0x17c   : > { %v1849_v15 = vmax.f32 %v1829_v0, 0.0  ;;  %v1848_v29 = vmax.f32 %v1828_v13, 0.0  ;;  %v2560_v63 = vadd.f32 %v3310_v9, %v212_v55  ;;  %v2571_v38 = vadd.f32 %v3314_v21, %v215_v22 }
 0x17d   : > { %v1866_v56 = vmin.f32 %v1846_v44, 32.0  ;;  %v1887_v37 = vmul.f32 %v2559_v60, %v1867_v45  ;;  %v1831_v33 = vadd.f32 16.0, %v2561_v12  ;;  %v2570_v26 = vadd.f32 %v3312_v17, %v214_v18 }
 0x17e   : > { %v1869_v57 = vmin.f32 %v1849_v15, 32.0  ;;  %v1868_v27 = vmin.f32 %v1848_v29, 32.0  ;;  %v1830_v20 = vadd.f32 16.0, %v2560_v63  ;;  %v1833_v41 = vadd.f32 16.0, %v2571_v38 }
 0x17f   : > { %2036 = vrot.lane.b32.xlu1 %v3334_v62, %s2697_s7  ;;  %2038 = vrot.lane.b32.xlu0 %v3308_v2, %s2697_s7  ;;  %v1886_v59 = vmul.f32 %v2558_v7, %v1866_v56  ;;  %v3393_v19 = vmul.f32 0.03125, %v1887_v37  ;;  %v1851_v42 = vmax.f32 %v1831_v33, 0.0  ;;  %v1832_v4 = vadd.f32 16.0, %v2570_v26 }
 0x180   : > { %v1889_v14 = vmul.f32 %v2569_v32, %v1869_v57  ;;  %v1888_v9 = vmul.f32 %v2568_v1, %v1868_v27  ;;  %v1850_v21 = vmax.f32 %v1830_v20, 0.0  ;;  %v1853_v17 = vmax.f32 %v1833_v41, 0.0 }
 0x181   : > { %v3396_v58 = vmul.f32 0.03125, %v1886_v59  ;;  %v1871_v6 = vmin.f32 %v1851_v42, 32.0  ;;  %v1852_v23 = vmax.f32 %v1832_v4, 0.0  ;;  %v2563_v60 = vadd.f32 %v3330_v61, %v217_v25 }
 0x182   : > { %v3403_v40 = vmul.f32 0.03125, %v1889_v14  ;;  %v3405_v47 = vmul.f32 0.03125, %v1888_v9  ;;  %v1870_v16 = vmin.f32 %v1850_v21, 32.0  ;;  %v1873_v46 = vmin.f32 %v1853_v17, 32.0 }
 0x183   : > { %2040 = vrot.lane.b32.xlu1 %v3320_v28, %s2697_s7  ;;  %1940 = vrot.lane.b32.xlu0 %v3334_v62, %s2696_s6  ;;  %v1891_v48 = vmul.f32 %v2561_v12, %v1871_v6  ;;  %v1872_v5 = vmin.f32 %v1852_v23, 32.0  ;;  %v2562_v7 = vadd.f32 %v3322_v49, %v216_v39  ;;  %v2573_v31 = vadd.f32 %v3326_v53, %v219_v8 }
 0x184   : > { %v1890_v3 = vmul.f32 %v2560_v63, %v1870_v16  ;;  %v1893_v30 = vmul.f32 %v2571_v38, %v1873_v46  ;;  %v1835_v49 = vadd.f32 16.0, %v2563_v60  ;;  %v2572_v1 = vadd.f32 %v3324_v51, %v218_v10 }
 0x185   : > { %v3433_v61 = vmul.f32 0.03125, %v1891_v48  ;;  %v1892_v35 = vmul.f32 %v2570_v26, %v1872_v5  ;;  %v1834_v54 = vadd.f32 16.0, %v2562_v7  ;;  %v1837_v0 = vadd.f32 16.0, %v2573_v31 }
 0x186   : > { %v3436_v32 = vmul.f32 0.03125, %v1890_v3  ;;  %v3443_v43 = vmul.f32 0.03125, %v1893_v30  ;;  %v1855_v44 = vmax.f32 %v1835_v49, 0.0  ;;  %v1836_v45 = vadd.f32 16.0, %v2572_v1 }
 0x187   : > { %1948 = vrot.lane.b32.xlu1 %v3356_v11, %s2696_s6  ;;  %1946 = vrot.lane.b32.xlu0 %v3358_v34, %s2696_s6  ;;  %v3445_v13 = vmul.f32 0.03125, %v1892_v35  ;;  %v1854_v53 = vmax.f32 %v1834_v54, 0.0  ;;  %v1857_v51 = vmax.f32 %v1837_v0, 0.0 }
 0x188   : > { %v1875_v15 = vmin.f32 %v1855_v44, 32.0  ;;  %v1856_v29 = vmax.f32 %v1836_v45, 0.0 }
 0x189   : > { %v1874_v56 = vmin.f32 %v1854_v53, 32.0  ;;  %v1877_v52 = vmin.f32 %v1857_v51, 32.0 }
 0x18a   : > { %v1895_v55 = vmul.f32 %v2563_v60, %v1875_v15  ;;  %v1876_v57 = vmin.f32 %v1856_v29, 32.0 }
 0x18b   : > { %1952 = vrot.lane.b32.xlu1 %v3364_v36, %s2696_s6  ;;  %1950 = vrot.lane.b32.xlu0 %v3366_v50, %s2696_s6  ;;  %v1894_v37 = vmul.f32 %v2562_v7, %v1874_v56  ;;  %v1897_v12 = vmul.f32 %v2573_v31, %v1877_v52 }
 0x18c   : > { %v3459_v59 = vmul.f32 0.03125, %v1895_v55  ;;  %v1896_v63 = vmul.f32 %v2572_v1, %v1876_v57 }
 0x18d   : > { %v3461_v27 = vmul.f32 0.03125, %v1894_v37  ;;  %v3467_v22 = vmul.f32 0.03125, %v1897_v12 }
 0x18e   : > { %v3469_v18 = vmul.f32 0.03125, %v1896_v63 }
 0x18f   : > { %2044 = vrot.lane.b32.xlu1 %v3356_v11, %s2697_s7  ;;  %2042 = vrot.lane.b32.xlu0 %v3358_v34, %s2697_s7 }
 0x193   : > { %2048 = vrot.lane.b32.xlu1 %v3364_v36, %s2697_s7  ;;  %2046 = vrot.lane.b32.xlu0 %v3366_v50, %s2697_s7 }
 0x197   : > { %1956 = vrot.lane.b32.xlu1 %v3393_v19, %s2696_s6  ;;  %1954 = vrot.lane.b32.xlu0 %v3396_v58, %s2696_s6 }
 0x19b   : > { %1960 = vrot.lane.b32.xlu1 %v3403_v40, %s2696_s6  ;;  %1958 = vrot.lane.b32.xlu0 %v3405_v47, %s2696_s6 }
 0x19f   : > { %2052 = vrot.lane.b32.xlu1 %v3393_v19, %s2697_s7  ;;  %2050 = vrot.lane.b32.xlu0 %v3396_v58, %s2697_s7 }
 0x1a3   : > { %2056 = vrot.lane.b32.xlu1 %v3403_v40, %s2697_s7  ;;  %2054 = vrot.lane.b32.xlu0 %v3405_v47, %s2697_s7 }
 0x1a7   : > { %1964 = vrot.lane.b32.xlu1 %v3433_v61, %s2696_s6  ;;  %1962 = vrot.lane.b32.xlu0 %v3436_v32, %s2696_s6 }
 0x1ab   : > { %1968 = vrot.lane.b32.xlu1 %v3443_v43, %s2696_s6  ;;  %1966 = vrot.lane.b32.xlu0 %v3445_v13, %s2696_s6 }
 0x1af   : > { %2060 = vrot.lane.b32.xlu1 %v3433_v61, %s2697_s7  ;;  %2058 = vrot.lane.b32.xlu0 %v3436_v32, %s2697_s7 }
 0x1b3   : > { %2064 = vrot.lane.b32.xlu1 %v3443_v43, %s2697_s7  ;;  %2062 = vrot.lane.b32.xlu0 %v3445_v13, %s2697_s7 }
 0x1b7   : > { %1972 = vrot.lane.b32.xlu1 %v3459_v59, %s2696_s6  ;;  %1970 = vrot.lane.b32.xlu0 %v3461_v27, %s2696_s6 }
 0x1bb   : > { %1976 = vrot.lane.b32.xlu1 %v3467_v22, %s2696_s6  ;;  %1974 = vrot.lane.b32.xlu0 %v3469_v18, %s2696_s6  ;;  %s2675_s6 = smul.u32 160, %s3824_s13 }
 0x1bd   : > { %s3530_s9 = scalar_lea.vmem %s3746_s3, %s2675_s6 }
 0x1bf   : > { %2068 = vrot.lane.b32.xlu1 %v3459_v59, %s2697_s7  ;;  %2066 = vrot.lane.b32.xlu0 %v3461_v27, %s2697_s7 }
 0x1c3   : > { %2072 = vrot.lane.b32.xlu1 %v3467_v22, %s2697_s7  ;;  %2070 = vrot.lane.b32.xlu0 %v3469_v18, %s2697_s7 }
 0x1e9   : > { %v1943_v14 = vpop.permute.xlu1 %1942  ;;  %v1939_v38 = vpop.permute.xlu0 %1938 }
 0x1ed   : > { %v1945_v33 = vpop.permute.xlu1 %1944  ;;  %v2035_v9 = vpop.permute.xlu0 %2034 }
 0x1ee   : > { %v2017_v39 = vadd.f32 %v1945_v33, %v3320_v28  ;;  %v1981_v48 = vsel %vm1978_vm1, %v1943_v14, %v1945_v33 }
 0x1ef   : > { %v2016_v31 = vadd.f32 %v1981_v48, %v3308_v2 }
 0x1f1   : > { %v2037_v20 = vpop.permute.xlu1 %2036  ;;  %v2039_v26 = vpop.permute.xlu0 %2038 }
 0x1f2   : > { %v2075_v60 = vsel %vm2074_vm2, %v2035_v9, %v2037_v20  ;;  %v2076_v28 = vsel %vm2074_vm2, %v2037_v20, %v2039_v26 }
 0x1f5   : > { %v2041_v41 = vpop.permute.xlu1 %2040  ;;  %v1941_v42 = vpop.permute.xlu0 %1940 }
 0x1f6   : > { %v1979_v17 = vsel %vm1978_vm1, %v1939_v38, %v1941_v42  ;;  %v1980_v16 = vsel %vm1978_vm1, %v1941_v42, %v1943_v14  ;;  %v2113_v3 = vadd.f32 %v2041_v41, %v2017_v39  ;;  %v2077_v8 = vsel %vm2074_vm2, %v2039_v26, %v2041_v41 }
 0x1f7   : > { %v2014_v23 = vadd.f32 %v1979_v17, %v3306_v24  ;;  %v2015_v5 = vadd.f32 %v1980_v16, %v3334_v62  ;;  %v2112_v0 = vadd.f32 %v2077_v8, %v2016_v31 }
 0x1f8   : > { %v2237_v44 = vrot.slane %v2113_v3, 2 }
 0x1f9   : > { %v1949_v21 = vpop.permute.xlu1 %1948  ;;  %v1947_v4 = vpop.permute.xlu0 %1946  ;;  %v2110_v10 = vadd.f32 %v2075_v60, %v2014_v23  ;;  %v2111_v53 = vadd.f32 %v2076_v28, %v2015_v5  ;;  %v2157_v38 = vrot.slane %v2112_v0, 1  ;;  %v2234_v20 = vrot.slane %v2112_v0, 2 }
 0x1fa   : > { %v1982_v46 = vsel %vm1978_vm1, %v1947_v4, %v1949_v21 }
 0x1fb   : > { %v2018_v30 = vadd.f32 %v1982_v46, %v3358_v34  ;;  %v2160_v34 = vrot.slane %v2113_v3, 1  ;;  %v2151_v2 = vrot.slane %v2110_v10, 1  ;;  %v2228_v57 = vrot.slane %v2110_v10, 2 }
 0x1fc   : > { %v2154_v26 = vrot.slane %v2111_v53, 1  ;;  %v2231_v23 = vrot.slane %v2111_v53, 2 }
 0x1fd   : > { %v1953_v6 = vpop.permute.xlu1 %1952  ;;  %v1951_v25 = vpop.permute.xlu0 %1950 }
 0x1fe   : > { %v2021_v35 = vadd.f32 %v1953_v6, %v3364_v36  ;;  %v1983_v54 = vsel %vm1978_vm1, %v1949_v21, %v1951_v25  ;;  %v1984_v62 = vsel %vm1978_vm1, %v1951_v25, %v1953_v6 }
 0x1ff   : > { %v2019_v29 = vadd.f32 %v1983_v54, %v3356_v11  ;;  %v2020_v52 = vadd.f32 %v1984_v62, %v3366_v50 }
 0x201   : > { %v2045_v7 = vpop.permute.xlu1 %2044  ;;  %v2043_v24 = vpop.permute.xlu0 %2042 }
 0x202   : > { %v2078_v49 = vsel %vm2074_vm2, %v2043_v24, %v2045_v7 }
 0x203   : > { %v3499_v1 = vadd.f32 %v2078_v49, %v2018_v30 }
 0x205   : > { %v2049_v45 = vpop.permute.xlu1 %2048  ;;  %v2152_v51 = vrot.slane %v3499_v1, 1  ;;  %v2229_v15 = vrot.slane %v3499_v1, 2  ;;  %v2047_v36 = vpop.permute.xlu0 %2046 }
 0x206   : > { %v3503_v56 = vadd.f32 %v2049_v45, %v2021_v35  ;;  %v2079_v55 = vsel %vm2074_vm2, %v2045_v7, %v2047_v36  ;;  %v2080_v37 = vsel %vm2074_vm2, %v2047_v36, %v2049_v45 }
 0x207   : > { %v2153_v12 = vsel %vm2150_vm3, %v2151_v2, %v2152_v51  ;;  %v3515_v9 = vadd.f32 %v2079_v55, %v2019_v29  ;;  %v3517_v11 = vadd.f32 %v2080_v37, %v2020_v52  ;;  %v2230_v41 = vsel %vm2227_vm4, %v2228_v57, %v2229_v15 }
 0x208   : > { %v2161_v63 = vrot.slane %v3503_v56, 1  ;;  %v2238_v14 = vrot.slane %v3503_v56, 2  ;;  %v2207_v33 = vadd.f32 %v2153_v12, %v2110_v10 }
 0x209   : > { %v1957_v50 = vpop.permute.xlu1 %1956  ;;  %v1955_v21 = vpop.permute.xlu0 %1954  ;;  %v2155_v6 = vrot.slane %v3515_v9, 1  ;;  %v2158_v16 = vrot.slane %v3517_v11, 1  ;;  %v2232_v39 = vrot.slane %v3515_v9, 2  ;;  %v2235_v46 = vrot.slane %v3517_v11, 2 }
 0x20a   : > { %v2162_v42 = vsel %vm2150_vm3, %v2160_v34, %v2161_v63  ;;  %v2284_v4 = vadd.f32 %v2230_v41, %v2207_v33  ;;  %v2239_v25 = vsel %vm2227_vm4, %v2237_v44, %v2238_v14  ;;  %v1985_v49 = vsel %vm1978_vm1, %v1955_v21, %v1957_v50 }
 0x20b   : > { %v2210_v17 = vadd.f32 %v2162_v42, %v2113_v3  ;;  %v2156_v3 = vsel %vm2150_vm3, %v2154_v26, %v2155_v6  ;;  %v2159_v5 = vsel %vm2150_vm3, %v2157_v38, %v2158_v16  ;;  %v2233_v31 = vsel %vm2227_vm4, %v2231_v23, %v2232_v39 }
 0x20c   : > { %v2304_v48 = vmul.f32 0.11111111, %v2284_v4  ;;  %v2208_v8 = vadd.f32 %v2156_v3, %v2111_v53  ;;  %v2209_v10 = vadd.f32 %v2159_v5, %v2112_v0  ;;  %v2236_v28 = vsel %vm2227_vm4, %v2234_v20, %v2235_v46 }
 0x20d   : > { %v2287_v60 = vadd.f32 %v2239_v25, %v2210_v17  ;;  %v1961_v7 = vpop.permute.xlu1 %1960  ;;  %v1959_v30 = vpop.permute.xlu0 %1958  ;;  %v2022_v44 = vadd.f32 %v1985_v49, %v3396_v58 }
 0x20e   : > { %2324 = vst [vmem:[%s3530_s9] sm:$0xff] %v2304_v48  ;;  %v2285_v35 = vadd.f32 %v2233_v31, %v2208_v8  ;;  %v2286_v54 = vadd.f32 %v2236_v28, %v2209_v10  ;;  %v2025_v2 = vadd.f32 %v1961_v7, %v3403_v40  ;;  %v1986_v36 = vsel %vm1978_vm1, %v1957_v50, %v1959_v30 }
 0x20f   : > { %v2307_v24 = vmul.f32 0.11111111, %v2287_v60  ;;  %v1987_v29 = vsel %vm1978_vm1, %v1959_v30, %v1961_v7  ;;  %v2023_v38 = vadd.f32 %v1986_v36, %v3393_v19 }
 0x210   : > { %v2305_v0 = vmul.f32 0.11111111, %v2285_v35  ;;  %v2306_v34 = vmul.f32 0.11111111, %v2286_v54  ;;  %v2024_v33 = vadd.f32 %v1987_v29, %v3405_v47 }
 0x211   : > { %2328 = vst.msk [vmem:[%s3530_s9 + $0x18] sm:$0xff] %vm2327_vm5, %v2307_v24  ;;  %v2053_v62 = vpop.permute.xlu1 %2052  ;;  %v2051_v53 = vpop.permute.xlu0 %2050 }
 0x212   : > { %v2081_v45 = vsel %vm2074_vm2, %v2051_v53, %v2053_v62  ;;  %2325 = vst [vmem:[%s3530_s9 + $0x8] sm:$0xff] %v2305_v0  ;;  %2326 = vst [vmem:[%s3530_s9 + $0x10] sm:$0xff] %v2306_v34 }
 0x213   : > { %v3560_v52 = vadd.f32 %v2081_v45, %v2022_v44 }
 0x215   : > { %v2057_v55 = vpop.permute.xlu1 %2056  ;;  %v2163_v37 = vrot.slane %v3560_v52, 1  ;;  %v2240_v57 = vrot.slane %v3560_v52, 2  ;;  %v2055_v58 = vpop.permute.xlu0 %2054 }
 0x216   : > { %v3564_v12 = vadd.f32 %v2057_v55, %v2025_v2  ;;  %v2082_v40 = vsel %vm2074_vm2, %v2053_v62, %v2055_v58  ;;  %v2083_v50 = vsel %vm2074_vm2, %v2055_v58, %v2057_v55 }
 0x217   : > { %v2164_v20 = vsel %vm2150_vm3, %v2152_v51, %v2163_v37  ;;  %v3578_v21 = vadd.f32 %v2082_v40, %v2023_v38  ;;  %v3580_v19 = vadd.f32 %v2083_v50, %v2024_v33  ;;  %v2241_v4 = vsel %vm2227_vm4, %v2229_v15, %v2240_v57 }
 0x218   : > { %v2169_v26 = vrot.slane %v3564_v12, 1  ;;  %v2246_v41 = vrot.slane %v3564_v12, 2  ;;  %v2211_v42 = vadd.f32 %v2164_v20, %v3499_v1 }
 0x219   : > { %v1965_v47 = vpop.permute.xlu1 %1964  ;;  %v1963_v17 = vpop.permute.xlu0 %1962  ;;  %v2165_v48 = vrot.slane %v3578_v21, 1  ;;  %v2167_v60 = vrot.slane %v3580_v19, 1  ;;  %v2242_v15 = vrot.slane %v3578_v21, 2  ;;  %v2244_v3 = vrot.slane %v3580_v19, 2 }
 0x21a   : > { %v2170_v51 = vsel %vm2150_vm3, %v2161_v63, %v2169_v26  ;;  %v2288_v23 = vadd.f32 %v2241_v4, %v2211_v42  ;;  %v2247_v1 = vsel %vm2227_vm4, %v2238_v14, %v2246_v41  ;;  %v1988_v31 = vsel %vm1978_vm1, %v1963_v17, %v1965_v47 }
 0x21b   : > { %v2214_v25 = vadd.f32 %v2170_v51, %v3503_v56  ;;  %v2166_v7 = vsel %vm2150_vm3, %v2155_v6, %v2165_v48  ;;  %v2168_v8 = vsel %vm2150_vm3, %v2158_v16, %v2167_v60  ;;  %v2243_v6 = vsel %vm2227_vm4, %v2232_v39, %v2242_v15 }
 0x21c   : > { %v2308_v63 = vmul.f32 0.11111111, %v2288_v23  ;;  %v2212_v56 = vadd.f32 %v2166_v7, %v3515_v9  ;;  %v2213_v14 = vadd.f32 %v2168_v8, %v3517_v11  ;;  %v2245_v16 = vsel %vm2227_vm4, %v2235_v46, %v2244_v3 }
 0x21d   : > { %v2291_v5 = vadd.f32 %v2247_v1, %v2214_v25  ;;  %v1969_v10 = vpop.permute.xlu1 %1968  ;;  %v1967_v30 = vpop.permute.xlu0 %1966  ;;  %v2026_v0 = vadd.f32 %v1988_v31, %v3436_v32 }
 0x21e   : > { %2329 = vst [vmem:[%s3530_s9 + $0x20] sm:$0xff] %v2308_v63  ;;  %v2289_v28 = vadd.f32 %v2243_v6, %v2212_v56  ;;  %v2290_v49 = vadd.f32 %v2245_v16, %v2213_v14  ;;  %v2029_v11 = vadd.f32 %v1969_v10, %v3443_v43  ;;  %v1989_v46 = vsel %vm1978_vm1, %v1965_v47, %v1967_v30 }
 0x21f   : > { %v2311_v24 = vmul.f32 0.11111111, %v2291_v5  ;;  %v1990_v34 = vsel %vm1978_vm1, %v1967_v30, %v1969_v10  ;;  %v2027_v29 = vadd.f32 %v1989_v46, %v3433_v61 }
 0x220   : > { %v2309_v54 = vmul.f32 0.11111111, %v2289_v28  ;;  %v2310_v62 = vmul.f32 0.11111111, %v2290_v49  ;;  %v2028_v55 = vadd.f32 %v1990_v34, %v3445_v13 }
 0x221   : > { %2332 = vst.msk [vmem:[%s3530_s9 + $0x38] sm:$0xff] %vm2327_vm5, %v2311_v24  ;;  %v2061_v35 = vpop.permute.xlu1 %2060  ;;  %v2059_v9 = vpop.permute.xlu0 %2058 }
 0x222   : > { %v2084_v39 = vsel %vm2074_vm2, %v2059_v9, %v2061_v35  ;;  %2330 = vst [vmem:[%s3530_s9 + $0x28] sm:$0xff] %v2309_v54  ;;  %2331 = vst [vmem:[%s3530_s9 + $0x30] sm:$0xff] %v2310_v62 }
 0x223   : > { %v3629_v44 = vadd.f32 %v2084_v39, %v2026_v0 }
 0x225   : > { %v2065_v53 = vpop.permute.xlu1 %2064  ;;  %v2171_v45 = vrot.slane %v3629_v44, 1  ;;  %v2248_v2 = vrot.slane %v3629_v44, 2  ;;  %v2063_v32 = vpop.permute.xlu0 %2062 }
 0x226   : > { %v3633_v36 = vadd.f32 %v2065_v53, %v2029_v11  ;;  %v2085_v43 = vsel %vm2074_vm2, %v2061_v35, %v2063_v32  ;;  %v2086_v58 = vsel %vm2074_vm2, %v2063_v32, %v2065_v53 }
 0x227   : > { %v2172_v38 = vsel %vm2150_vm3, %v2163_v37, %v2171_v45  ;;  %v3647_v20 = vadd.f32 %v2085_v43, %v2027_v29  ;;  %v3649_v61 = vadd.f32 %v2086_v58, %v2028_v55  ;;  %v2249_v42 = vsel %vm2227_vm4, %v2240_v57, %v2248_v2 }
 0x228   : > { %v2177_v33 = vrot.slane %v3633_v36, 1  ;;  %v2254_v40 = vrot.slane %v3633_v36, 2  ;;  %v2215_v50 = vadd.f32 %v2172_v38, %v3560_v52 }
 0x229   : > { %v1973_v13 = vpop.permute.xlu1 %1972  ;;  %v1971_v47 = vpop.permute.xlu0 %1970  ;;  %v2173_v17 = vrot.slane %v3647_v20, 1  ;;  %v2175_v23 = vrot.slane %v3649_v61, 1  ;;  %v2250_v57 = vrot.slane %v3647_v20, 2  ;;  %v2252_v25 = vrot.slane %v3649_v61, 2 }
 0x22a   : > { %v2178_v37 = vsel %vm2150_vm3, %v2169_v26, %v2177_v33  ;;  %v2292_v4 = vadd.f32 %v2249_v42, %v2215_v50  ;;  %v2255_v52 = vsel %vm2227_vm4, %v2246_v41, %v2254_v40  ;;  %v1991_v56 = vsel %vm1978_vm1, %v1971_v47, %v1973_v13 }
 0x22b   : > { %v2218_v51 = vadd.f32 %v2178_v37, %v3564_v12  ;;  %v2174_v63 = vsel %vm2150_vm3, %v2165_v48, %v2173_v17  ;;  %v2176_v5 = vsel %vm2150_vm3, %v2167_v60, %v2175_v23  ;;  %v2251_v48 = vsel %vm2227_vm4, %v2242_v15, %v2250_v57 }
 0x22c   : > { %v2312_v26 = vmul.f32 0.11111111, %v2292_v4  ;;  %v2216_v12 = vadd.f32 %v2174_v63, %v3578_v21  ;;  %v2217_v41 = vadd.f32 %v2176_v5, %v3580_v19  ;;  %v2253_v60 = vsel %vm2227_vm4, %v2244_v3, %v2252_v25 }
 0x22d   : > { %v2295_v1 = vadd.f32 %v2255_v52, %v2218_v51  ;;  %v1977_v7 = vpop.permute.xlu1 %1976  ;;  %v1975_v8 = vpop.permute.xlu0 %1974  ;;  %v2030_v31 = vadd.f32 %v1991_v56, %v3461_v27 }
 0x22e   : > { %2333 = vst [vmem:[%s3530_s9 + $0x40] sm:$0xff] %v2312_v26  ;;  %v2293_v14 = vadd.f32 %v2251_v48, %v2216_v12  ;;  %v2294_v30 = vadd.f32 %v2253_v60, %v2217_v41  ;;  %v2033_v19 = vadd.f32 %v1977_v7, %v3467_v22  ;;  %v1992_v3 = vsel %vm1978_vm1, %v1973_v13, %v1975_v8 }
 0x22f   : > { %v2315_v10 = vmul.f32 0.11111111, %v2295_v1  ;;  %v1993_v28 = vsel %vm1978_vm1, %v1975_v8, %v1977_v7  ;;  %v2031_v39 = vadd.f32 %v1992_v3, %v3459_v59 }
 0x230   : > { %v2313_v6 = vmul.f32 0.11111111, %v2293_v14  ;;  %v2314_v16 = vmul.f32 0.11111111, %v2294_v30  ;;  %v2032_v27 = vadd.f32 %v1993_v28, %v3469_v18 }
 0x231   : > { %2336 = vst.msk [vmem:[%s3530_s9 + $0x58] sm:$0xff] %vm2327_vm5, %v2315_v10  ;;  %v2069_v24 = vpop.permute.xlu1 %2068  ;;  %v2067_v21 = vpop.permute.xlu0 %2066 }
 0x232   : > { %v2087_v15 = vsel %vm2074_vm2, %v2067_v21, %v2069_v24  ;;  %2334 = vst [vmem:[%s3530_s9 + $0x48] sm:$0xff] %v2313_v6  ;;  %2335 = vst [vmem:[%s3530_s9 + $0x50] sm:$0xff] %v2314_v16 }
 0x233   : > { %v2126_v49 = vadd.f32 %v2087_v15, %v2030_v31 }
 0x235   : > { %v2073_v35 = vpop.permute.xlu1 %2072  ;;  %v2179_v54 = vrot.slane %v2126_v49, 1  ;;  %v2256_v62 = vrot.slane %v2126_v49, 2  ;;  %v2071_v9 = vpop.permute.xlu0 %2070 }
 0x236   : > { %v2129_v0 = vadd.f32 %v2073_v35, %v2033_v19  ;;  %v2088_v11 = vsel %vm2074_vm2, %v2069_v24, %v2071_v9  ;;  %v2089_v46 = vsel %vm2074_vm2, %v2071_v9, %v2073_v35 }
 0x237   : > { %v2180_v22 = vsel %vm2150_vm3, %v2171_v45, %v2179_v54  ;;  %v2223_v34 = vadd.f32 %v2179_v54, %v2126_v49  ;;  %v2127_v55 = vadd.f32 %v2088_v11, %v2031_v39  ;;  %v2128_v43 = vadd.f32 %v2089_v46, %v2032_v27 }
 0x238   : > { %v2185_v53 = vrot.slane %v2129_v0, 1  ;;  %v2219_v32 = vadd.f32 %v2180_v22, %v3629_v44  ;;  %v2262_v29 = vrot.slane %v2129_v0, 2  ;;  %v2257_v59 = vsel %vm2227_vm4, %v2248_v2, %v2256_v62 }
 0x239   : > { %v2300_v18 = vadd.f32 %v2256_v62, %v2223_v34  ;;  %v2181_v42 = vrot.slane %v2127_v55, 1  ;;  %v2183_v47 = vrot.slane %v2128_v43, 1  ;;  %v2258_v2 = vrot.slane %v2127_v55, 2 }
 0x23a   : > { %v2186_v58 = vsel %vm2150_vm3, %v2177_v33, %v2185_v53  ;;  %v2226_v38 = vadd.f32 %v2185_v53, %v2129_v0  ;;  %v2296_v45 = vadd.f32 %v2257_v59, %v2219_v32  ;;  %v2263_v13 = vsel %vm2227_vm4, %v2254_v40, %v2262_v29 }
 0x23b   : > { %v2222_v50 = vadd.f32 %v2186_v58, %v3633_v36  ;;  %v2320_v37 = vmul.f32 0.11111111, %v2300_v18  ;;  %v2182_v33 = vsel %vm2150_vm3, %v2173_v17, %v2181_v42  ;;  %v2224_v52 = vadd.f32 %v2181_v42, %v2127_v55 }
 0x23c   : > { %v2303_v44 = vadd.f32 %v2262_v29, %v2226_v38  ;;  %v2316_v4 = vmul.f32 0.11111111, %v2296_v45  ;;  %v2184_v36 = vsel %vm2150_vm3, %v2175_v23, %v2183_v47  ;;  %v2220_v40 = vadd.f32 %v2182_v33, %v3647_v20 }
 0x23d   : > { %v2299_v51 = vadd.f32 %v2263_v13, %v2222_v50  ;;  %2341 = vst [vmem:[%s3530_s9 + $0x80] sm:$0x3f] %v2320_v37  ;;  %v2225_v1 = vadd.f32 %v2183_v47, %v2128_v43  ;;  %v2221_v5 = vadd.f32 %v2184_v36, %v3649_v61  ;;  %v2259_v17 = vsel %vm2227_vm4, %v2250_v57, %v2258_v2 }
 0x23e   : > { %v2323_v26 = vmul.f32 0.11111111, %v2303_v44  ;;  %2337 = vst [vmem:[%s3530_s9 + $0x60] sm:$0xff] %v2316_v4  ;;  %v2260_v7 = vrot.slane %v2128_v43, 2  ;;  %v2297_v12 = vadd.f32 %v2259_v17, %v2220_v40  ;;  %v2301_v23 = vadd.f32 %v2258_v2, %v2224_v52 }
 0x23f   : > { %v2319_v63 = vmul.f32 0.11111111, %v2299_v51 }
 0x240   : > { %2345 = vst.msk [vmem:[%s3530_s9 + $0x98] sm:$0x3f] %vm2344_vm6, %v2323_v26  ;;  %v2261_v41 = vsel %vm2227_vm4, %v2252_v25, %v2260_v7  ;;  %v2302_v8 = vadd.f32 %v2260_v7, %v2225_v1  ;;  %v2317_v48 = vmul.f32 0.11111111, %v2297_v12  ;;  %v2321_v60 = vmul.f32 0.11111111, %v2301_v23 }
 0x241   : > { %2340 = vst.msk [vmem:[%s3530_s9 + $0x78] sm:$0xff] %vm2327_vm5, %v2319_v63  ;;  %v2298_v10 = vadd.f32 %v2261_v41, %v2221_v5 }
 0x242   : > { %v2322_v20 = vmul.f32 0.11111111, %v2302_v8  ;;  %2338 = vst [vmem:[%s3530_s9 + $0x68] sm:$0xff] %v2317_v48  ;;  %2342 = vst [vmem:[%s3530_s9 + $0x88] sm:$0x3f] %v2321_v60 }
 0x243   : > { %v2318_v56 = vmul.f32 0.11111111, %v2298_v10 }
 0x244   : > { %2343 = vst [vmem:[%s3530_s9 + $0x90] sm:$0x3f] %v2322_v20 }
 0x245   : > { %2339 = vst [vmem:[%s3530_s9 + $0x70] sm:$0xff] %v2318_v56 }
 0x246 PF: > { %s13_s12 = sadd.s32 1, %s2693_s12  }
 0x247   : > { %p10_p4 = scmp.ge.s32.totalorder %s13_s12, 4  }
 0x249   :  { %12 = sbr.rel (!%p10_p4) target bundleno = 1 (0x1), region = 62 }

</bundles_post_ra>
